<compile_context>
chip_gen: v5e
topology: v5e:2x2
jax: 0.10.0
libtpu: 0.0.40
codegen_flags: <defaults>
</compile_context>

<pallas_src>
import numpy as np

import jax
import jax.numpy as jnp
from jax import lax
from jax.experimental import pallas as pl
from jax.experimental.pallas import tpu as pltpu


def _round_up(x, m):
    return ((x + m - 1) // m) * m


def _tile_bytes(rows, cols, itemsize):
    """Approximate VMEM footprint of one (rows, cols) tile after (sublane, 128)
    padding."""
    sub = 8 if itemsize >= 4 else (16 if itemsize == 2 else 32)
    return _round_up(rows, sub) * _round_up(cols, 128) * itemsize


# ----------------------------------------------------------------------------
# Pallas kernel: cosine-similarity prompt selection + weighted prompt mixing
# ----------------------------------------------------------------------------
def _osprompt_kernel(xq_ori_ref,   # (tb, D)     f32  original x_querry tile
                     q_ref,        # (tb, D)     f32  x_block[:, 0, :] tile
                     kT_ref,       # (D, pool)   bf16 pre-normalized, masked keys
                     pflat_ref,    # (pool, LDp) bf16 masked, lane-padded prompts
                     pout_ref,     # (tb, LDp)   mixed prompts (bf16 by default)
                     sse_ref):     # (1, 1) SMEM f32  per-block sum-sq-error
    eps = 1e-12  # matches torch F.normalize default eps

    q = q_ref[...].astype(jnp.float32)
    xq_ori = xq_ori_ref[...].astype(jnp.float32)

    # F.normalize(x, dim=-1) == x / max(||x||, eps).  rsqrt runs on the EUP
    # slot; the guard keeps the eps clamp so zero rows normalize to exactly 0.
    ss = jnp.sum(q * q, axis=1, keepdims=True)
    inv_norm = jnp.where(ss > eps * eps, lax.rsqrt(ss), 1.0 / eps)
    n_q = (q * inv_norm).astype(jnp.bfloat16)

    # Keys were normalized / task-masked / transposed on the host, so this is a
    # plain (tb, D) x (D, pool) MXU matmul with f32 accumulation.
    # NOTE: the PyTorch forward also computes aq_k_ori (similarity against
    # x_querry_ori) but it is dead code w.r.t. every returned value -> omitted.
    aq_k = jnp.dot(n_q, kT_ref[...], preferred_element_type=jnp.float32)

    # P_ = einsum('bk,kld->bld', aq_k, p) == aq_k @ p.reshape(pool, L*D).
    # Rows >= f of pflat are zero, so using the full pool is exact.
    pout_ref[...] = jnp.dot(aq_k.astype(jnp.bfloat16), pflat_ref[...],
                            preferred_element_type=jnp.float32
                            ).astype(pout_ref.dtype)

    # Partial of sum((x_querry_new - x_querry_ori)^2); finalized on the host.
    diff = q - xq_ori
    sse_ref[0, 0] = jnp.sum(diff * diff)


def _pick_batch_tile(batch, cap=256):
    """Largest multiple-of-8 divisor of `batch` that is <= cap, preferring a
    choice that yields >= 2 grid blocks (so v7x's second TensorCore gets work).
    Cap of 256 feeds v6e/v7x's 256x256 MXU with full M tiles."""
    divisors = [d for d in range(8, min(cap, batch) + 1, 8) if batch % d == 0]
    if not divisors:
        return batch
    multi = [d for d in divisors if batch // d >= 2]
    return max(multi) if multi else max(divisors)


# ----------------------------------------------------------------------------
# Python-side module glue (parameter setup, host-side prep, reshape/split)
# ----------------------------------------------------------------------------
def _gram_schmidt_init(key, pool, dim, pt):
    """Deterministic analogue of OSPrompt.gram_schmidt at task_count=0:
    rows [0, pt) are orthonormal random vectors, remaining rows are zero."""
    # TODO(synk): the iterative randomized Gram-Schmidt re-orthogonalization is
    # host-side init code (not a kernel); approximated with a QR-based init.
    g = jax.random.normal(key, (dim, pt), jnp.float32)
    qmat, _ = jnp.linalg.qr(g)                 # (dim, pt), orthonormal columns
    rows = qmat.T                              # (pt, dim), orthonormal rows
    return jnp.concatenate(
        [rows, jnp.zeros((pool - pt, dim), jnp.float32)], axis=0)


class OSPromptPallas:
    def __init__(self, emb_d, n_tasks, prompt_param, key_dim=768, *,
                 rng_key, prompt_dtype=jnp.bfloat16):
        self.task_count = 0
        self.emb_d = emb_d
        self.key_d = key_dim
        self.n_tasks = n_tasks
        self.e_pool_size = int(prompt_param[0])
        self.e_p_length = int(prompt_param[1])
        self.qr_loss_weight = float(prompt_param[2])
        self.e_layers = [0, 1, 2, 3, 4]
        # dtype of the mixed prompts handed downstream; bf16 halves the
        # dominant HBM writeback.  Use jnp.float32 for exact PyTorch parity.
        self.prompt_dtype = prompt_dtype

        pt = self.e_pool_size // self.n_tasks
        self.e_p = {}   # f32 (pool, L, emb_d)
        self.e_k = {}   # f32 (pool, key_d)
        for e in self.e_layers:
            rng_key, kp, kk = jax.random.split(rng_key, 3)
            p_flat = _gram_schmidt_init(kp, self.e_pool_size,
                                        self.e_p_length * emb_d, pt)
            self.e_p[e] = p_flat.reshape(self.e_pool_size, self.e_p_length, emb_d)
            self.e_k[e] = _gram_schmidt_init(kk, self.e_pool_size, self.key_d, pt)

        self._pool_cache = {}   # (layer, task_count) -> (kT, pflat, LDp)
        self._call_cache = {}   # shape signature -> pallas_call callable

    def process_task_count(self):
        # TODO(synk): the original re-runs randomized Gram-Schmidt on the new
        # task's rows; only the bookkeeping + cache invalidation is mirrored.
        self.task_count += 1
        self._pool_cache.clear()

    # ---- host-side preparation of grid-invariant operands (cached per task) --
    def _prepared_pools(self, l):
        key = (l, self.task_count)
        if key not in self._pool_cache:
            eps = 1e-12
            pool, L, D = self.e_pool_size, self.e_p_length, self.emb_d
            pt = pool // self.n_tasks
            f = (self.task_count + 1) * pt
            # In every branch of the PyTorch forward the rows whose *values*
            # are used are exactly [0, f) (detach only affects gradients), so
            # we keep fixed full-pool shapes and zero rows >= f here.
            valid = (jnp.arange(pool) < f)[:, None]

            K = self.e_k[l]
            n_K = K / jnp.maximum(jnp.linalg.norm(K, axis=1, keepdims=True), eps)
            n_K = jnp.where(valid, n_K, 0.0)
            kT = n_K.T.astype(jnp.bfloat16)               # (key_d, pool)

            LD = L * D
            LDp = _round_up(LD, 128)                      # lane-dense output
            p_flat = self.e_p[l].reshape(pool, LD)
            p_flat = jnp.where(valid, p_flat, 0.0)
            if LDp != LD:
                p_flat = jnp.pad(p_flat, ((0, 0), (0, LDp - LD)))
            self._pool_cache[key] = (kT, p_flat.astype(jnp.bfloat16), LDp)
        return self._pool_cache[key]

    # ---- pallas_call construction --------------------------------------------
    def _build_call(self, B, D, pool, LDp, tb, single_buffer_resident):
        nb = B // tb
        resident_kwargs = (dict(pipeline_mode=pl.Buffered(1))
                           if single_buffer_resident else {})

        grid_spec = pltpu.PrefetchScalarGridSpec(
            num_scalar_prefetch=0,
            grid=(nb,),
            in_specs=[
                pl.BlockSpec((tb, D), lambda b: (b, 0)),        # x_querry_ori
                pl.BlockSpec((tb, D), lambda b: (b, 0)),        # x_block[:,0,:]
                pl.BlockSpec((D, pool), lambda b: (0, 0),       # keys (resident)
                             **resident_kwargs),
                pl.BlockSpec((pool, LDp), lambda b: (0, 0),     # prompts (resident)
                             **resident_kwargs),
            ],
            out_specs=(
                pl.BlockSpec((tb, LDp), lambda b: (b, 0)),
                pl.BlockSpec((1, 1), lambda b: (b, 0),
                             memory_space=pltpu.MemorySpace.SMEM),
            ),
        )

        # VMEM budget: double-buffered query/output tiles plus the resident
        # pools counted double-buffered (covers the non-Buffered(1) fallback),
        # clamped below the physical VMEM of the current chip (64 MiB/TC on
        # v7x) with headroom for Mosaic internal scratch.  Always set, so the
        # v5e 16 MiB default never silently gates the tiles.
        out_isz = np.dtype(self.prompt_dtype).itemsize
        est = (2 * 2 * _tile_bytes(tb, D, 4)           # two f32 query tiles
               + 2 * _tile_bytes(D, pool, 2)           # resident keys (bf16)
               + 2 * _tile_bytes(pool, LDp, 2)         # resident prompts (bf16)
               + 2 * _tile_bytes(tb, LDp, out_isz))    # output tile
        try:
            phys = pltpu.get_tpu_info().vmem_capacity_bytes
        except Exception:
            phys = 64 << 20                            # v7x worst case
        cap = (phys * 3) // 4
        vmem_limit = int(min(cap, max(est + est // 4 + (2 << 20), 32 << 20)))

        return pl.pallas_call(
            _osprompt_kernel,
            grid_spec=grid_spec,
            out_shape=(jax.ShapeDtypeStruct((B, LDp), self.prompt_dtype),
                       jax.ShapeDtypeStruct((nb, 1), jnp.float32)),
            compiler_params=pltpu.CompilerParams(
                dimension_semantics=("parallel",),
                vmem_limit_bytes=vmem_limit),
        )

    # ---- forward --------------------------------------------------------------
    def forward(self, x_querry, l, x_block, train=False, task_id=None):
        if l not in self.e_layers:
            return None, 0.0, x_block

        B, D = x_querry.shape
        L = self.e_p_length
        LD = L * self.emb_d

        kT, p_flat, LDp = self._prepared_pools(l)
        pool = self.e_pool_size

        # Only token 0 of x_block feeds the kernel.
        # TODO(synk): a (tb, 1, D) BlockSpec on x_block would avoid this tiny
        # host-side slice, but a second-minor block dim of 1 is not portable
        # across Mosaic versions; the slice is O(B*D) and negligible.
        x_q_new = x_block[:, 0, :]

        tb = _pick_batch_tile(B)
        sig = (B, D, pool, LDp, tb, np.dtype(self.prompt_dtype).name)

        if sig in self._call_cache:
            P_flat, sse_parts = self._call_cache[sig](x_querry, x_q_new, kT, p_flat)
        else:
            # Resident pools request single buffering (Buffered(1)) to halve
            # their VMEM footprint; fall back to default double-buffering if
            # the installed Pallas rejects it.
            try:
                call = self._build_call(B, D, pool, LDp, tb, True)
                P_flat, sse_parts = call(x_querry, x_q_new, kT, p_flat)
            except Exception:
                call = self._build_call(B, D, pool, LDp, tb, False)
                P_flat, sse_parts = call(x_querry, x_q_new, kT, p_flat)
            self._call_cache[sig] = call

        # loss = MSE(x_querry_new, x_querry_ori) * qr_loss_weight (f32 path)
        loss = (jnp.sum(sse_parts) / (B * D)) * self.qr_loss_weight

        if LDp != LD:
            P_flat = P_flat[:, :LD]
        P_ = P_flat.reshape(B, L, self.emb_d)
        i = L // 2
        Ek = P_[:, :i, :]
        Ev = P_[:, i:, :]
        return [Ek, Ev], loss, x_block


# ----------------------------------------------------------------------------
# Pure-JAX f32 reference (mirrors the used part of the PyTorch forward)
# ----------------------------------------------------------------------------
def _ref_forward(x_querry, x_block, K, p, qr_loss_weight):
    eps = 1e-12
    q = x_block[:, 0, :]
    n_K = K / jnp.maximum(jnp.linalg.norm(K, axis=1, keepdims=True), eps)
    n_q = q / jnp.maximum(jnp.linalg.norm(q, axis=1, keepdims=True), eps)
    aq_k = n_q @ n_K.T
    P_ = jnp.einsum('bk,kld->bld', aq_k, p)
    loss = jnp.mean((q - x_querry) ** 2) * qr_loss_weight
    return P_, loss


if __name__ == "__main__":
    # Small shapes consistent with the module (emb_d == key_d is required by
    # the einsum between x_block[:, 0, :] and K in the original forward).
    emb_d = 32
    key_d = 32
    n_tasks = 2
    prompt_param = [8, 4, 0.5]   # pool_size=8, e_p_length=4, qr_loss_weight=0.5
    B, N = 2, 8
    layer = 0

    key = jax.random.PRNGKey(0)
    key, k_mod, k_q, k_blk, k_pk, k_pp = jax.random.split(key, 6)

    module = OSPromptPallas(emb_d, n_tasks, prompt_param, key_dim=key_d,
                            rng_key=k_mod)

    pool = module.e_pool_size
    L = module.e_p_length
    f_act = (module.task_count + 1) * (pool // n_tasks)
    # Poison pool rows outside the active window [0, f) so the wrapper-side
    # task masking is genuinely exercised (init leaves those rows zero).
    module.e_k[layer] = module.e_k[layer].at[f_act:].set(
        jax.random.normal(k_pk, (pool - f_act, key_d), jnp.float32))
    module.e_p[layer] = module.e_p[layer].at[f_act:].set(
        jax.random.normal(k_pp, (pool - f_act, L, emb_d), jnp.float32))

    x_querry = jax.random.normal(k_q, (B, key_d), jnp.float32)
    x_block = jax.random.normal(k_blk, (B, N, emb_d), jnp.float32)

    p_return, loss, x_block_out = module.forward(x_querry, layer, x_block,
                                                 train=False)
    Ek, Ev = p_return
    jax.block_until_ready((Ek, Ev, loss))

    # Correctness check against the pure-JAX f32 reference restricted to the
    # active rows [:f] (matching the PyTorch slicing).
    P_ref, loss_ref = _ref_forward(x_querry, x_block,
                                   module.e_k[layer][:f_act],
                                   module.e_p[layer][:f_act],
                                   module.qr_loss_weight)
    i = L // 2
    assert Ek.shape == (B, i, emb_d) and Ev.shape == (B, i, emb_d)
    # bf16 MXU operands + bf16 output storage -> bf16-level tolerance vs. the
    # all-f32 reference.
    assert jnp.allclose(Ek.astype(jnp.float32), P_ref[:, :i, :],
                        atol=3e-2, rtol=3e-2)
    assert jnp.allclose(Ev.astype(jnp.float32), P_ref[:, i:, :],
                        atol=3e-2, rtol=3e-2)
    # Loss path is entirely f32 -> tight tolerance.
    assert jnp.allclose(loss, loss_ref, atol=1e-6, rtol=1e-5)
    assert x_block_out.shape == x_block.shape

    print("KERNEL_OK")
</pallas_src>

<mosaic_0001>
module attributes {stable_mosaic.version = 11 : i64} {
  func.func @_osprompt_kernel(%arg0: i32, %arg1: memref<2x32xf32, #tpu.memory_space<vmem>>, %arg2: memref<2x32xf32, #tpu.memory_space<vmem>>, %arg3: memref<32x8xbf16, #tpu.memory_space<vmem>>, %arg4: memref<8x128xbf16, #tpu.memory_space<vmem>>, %arg5: memref<2x128xbf16, #tpu.memory_space<vmem>>, %arg6: memref<1x1xf32, #tpu.memory_space<smem>>) attributes {dimension_semantics = [#tpu.dimension_semantics<parallel>], iteration_bounds = array<i64: 1>, scalar_prefetch = 0 : i64, scratch_operands = 0 : i64, tpu.core_type = #tpu.core_type<tc>, window_params = [{transform_indices = @transform_0, window_bounds = array<i64: 2, 32>}, {transform_indices = @transform_1, window_bounds = array<i64: 2, 32>}, {pipeline_mode = #tpu.pipeline_mode<synchronous>, transform_indices = @transform_2, window_bounds = array<i64: 32, 8>}, {pipeline_mode = #tpu.pipeline_mode<synchronous>, transform_indices = @transform_3, window_bounds = array<i64: 8, 128>}, {transform_indices = @transform_4, window_bounds = array<i64: 2, 128>}, {transform_indices = @transform_5, window_bounds = array<i64: 1, 1>}]} {
    %c0 = arith.constant 0 : index
    %c0_0 = arith.constant 0 : index
    %0 = vector.load %arg2[%c0, %c0_0] : memref<2x32xf32, #tpu.memory_space<vmem>>, vector<2x32xf32>
    %c0_1 = arith.constant 0 : index
    %c0_2 = arith.constant 0 : index
    %1 = vector.load %arg1[%c0_1, %c0_2] : memref<2x32xf32, #tpu.memory_space<vmem>>, vector<2x32xf32>
    %2 = arith.mulf %0, %0 : vector<2x32xf32>
    %cst = arith.constant dense<0.000000e+00> : vector<2xf32>
    %3 = vector.multi_reduction <add>, %2, %cst [1] : vector<2x32xf32> to vector<2xf32>
    %4 = vector.shape_cast %3 : vector<2xf32> to vector<2x1xf32>
    %cst_3 = arith.constant 1.000000e-24 : f32
    %5 = vector.broadcast %cst_3 : f32 to vector<2x1xf32>
    %6 = arith.cmpf ogt, %4, %5 : vector<2x1xf32>
    %7 = math.rsqrt %4 : vector<2x1xf32>
    %cst_4 = arith.constant 9.99999995E+11 : f32
    %8 = vector.broadcast %cst_4 : f32 to vector<2x1xf32>
    %9 = arith.select %6, %7, %8 : vector<2x1xi1>, vector<2x1xf32>
    %10 = vector.broadcast %9 : vector<2x1xf32> to vector<2x32xf32>
    %11 = arith.mulf %0, %10 : vector<2x32xf32>
    %12 = arith.truncf %11 : vector<2x32xf32> to vector<2x32xbf16>
    %c0_5 = arith.constant 0 : index
    %c0_6 = arith.constant 0 : index
    %13 = vector.load %arg3[%c0_5, %c0_6] : memref<32x8xbf16, #tpu.memory_space<vmem>>, vector<32x8xbf16>
    %cst_7 = arith.constant dense<0.000000e+00> : vector<2x8xf32>
    %14 = tpu.matmul %12, %13, %cst_7 {dimension_numbers = #tpu.dot_dimension_numbers<[1], [0], [0], [1], [0, 0, 1, 1], [], []>} : vector<2x32xbf16>, vector<32x8xbf16>, vector<2x8xf32> -> vector<2x8xf32>
    %15 = arith.truncf %14 : vector<2x8xf32> to vector<2x8xbf16>
    %c0_8 = arith.constant 0 : index
    %c0_9 = arith.constant 0 : index
    %16 = vector.load %arg4[%c0_8, %c0_9] : memref<8x128xbf16, #tpu.memory_space<vmem>>, vector<8x128xbf16>
    %cst_10 = arith.constant dense<0.000000e+00> : vector<2x128xf32>
    %17 = tpu.matmul %15, %16, %cst_10 {dimension_numbers = #tpu.dot_dimension_numbers<[1], [0], [0], [1], [0, 0, 1, 1], [], []>} : vector<2x8xbf16>, vector<8x128xbf16>, vector<2x128xf32> -> vector<2x128xf32>
    %18 = arith.truncf %17 : vector<2x128xf32> to vector<2x128xbf16>
    %c0_11 = arith.constant 0 : index
    %c0_12 = arith.constant 0 : index
    %19 = vector.load %arg5[%c0_11, %c0_12] : memref<2x128xbf16, #tpu.memory_space<vmem>>, vector<2x128xbf16>
    tpu.vector_store %arg5[%c0_11, %c0_12], %18 {strides = array<i32>} : memref<2x128xbf16, #tpu.memory_space<vmem>>, vector<2x128xbf16>,
    %20 = arith.subf %0, %1 : vector<2x32xf32>
    %21 = arith.mulf %20, %20 : vector<2x32xf32>
    %22 = vector.shape_cast %21 : vector<2x32xf32> to vector<1x2x32xf32>
    %cst_13 = arith.constant dense<0.000000e+00> : vector<1xf32>
    %23 = vector.multi_reduction <add>, %22, %cst_13 [1, 2] : vector<1x2x32xf32> to vector<1xf32>
    %24 = vector.shape_cast %23 : vector<1xf32> to vector<1x1x1xf32>
    %25 = vector.extract %24[0, 0, 0] : f32 from vector<1x1x1xf32>
    %c0_14 = arith.constant 0 : index
    %c0_15 = arith.constant 0 : index
    %26 = memref.load %arg6[%c0_14, %c0_15] : memref<1x1xf32, #tpu.memory_space<smem>>
    memref.store %25, %arg6[%c0_14, %c0_15] : memref<1x1xf32, #tpu.memory_space<smem>>
    return
  }
  func.func @transform_0(%arg0: i32) -> (i32, i32) {
    %c0_i32 = arith.constant 0 : i32
    %c0_i32_0 = arith.constant 0 : i32
    return %arg0, %c0_i32 : i32, i32
  }
  func.func @transform_1(%arg0: i32) -> (i32, i32) {
    %c0_i32 = arith.constant 0 : i32
    %c0_i32_0 = arith.constant 0 : i32
    return %arg0, %c0_i32 : i32, i32
  }
  func.func @transform_2(%arg0: i32) -> (i32, i32) {
    %c0_i32 = arith.constant 0 : i32
    %c0_i32_0 = arith.constant 0 : i32
    %c0_i32_1 = arith.constant 0 : i32
    return %c0_i32, %c0_i32_0 : i32, i32
  }
  func.func @transform_3(%arg0: i32) -> (i32, i32) {
    %c0_i32 = arith.constant 0 : i32
    %c0_i32_0 = arith.constant 0 : i32
    %c0_i32_1 = arith.constant 0 : i32
    return %c0_i32, %c0_i32_0 : i32, i32
  }
  func.func @transform_4(%arg0: i32) -> (i32, i32) {
    %c0_i32 = arith.constant 0 : i32
    %c0_i32_0 = arith.constant 0 : i32
    return %arg0, %c0_i32 : i32, i32
  }
  func.func @transform_5(%arg0: i32) -> (i32, i32) {
    %c0_i32 = arith.constant 0 : i32
    %c0_i32_0 = arith.constant 0 : i32
    return %arg0, %c0_i32 : i32, i32
  }
}

module attributes {stable_mosaic.version = 11 : i64} {
  func.func @_osprompt_kernel(%arg0: i32, %arg1: memref<2x32xf32, #tpu.memory_space<vmem>>, %arg2: memref<2x32xf32, #tpu.memory_space<vmem>>, %arg3: memref<32x8xbf16, #tpu.memory_space<vmem>>, %arg4: memref<8x128xbf16, #tpu.memory_space<vmem>>, %arg5: memref<2x128xbf16, #tpu.memory_space<vmem>>, %arg6: memref<1x1xf32, #tpu.memory_space<smem>>) attributes {dimension_semantics = [#tpu.dimension_semantics<parallel>], iteration_bounds = array<i64: 1>, scalar_prefetch = 0 : i64, scratch_operands = 0 : i64, tpu.core_type = #tpu.core_type<tc>, window_params = [{transform_indices = @transform_0, window_bounds = array<i64: 2, 32>}, {transform_indices = @transform_1, window_bounds = array<i64: 2, 32>}, {pipeline_mode = #tpu.pipeline_mode<synchronous>, transform_indices = @transform_2, window_bounds = array<i64: 32, 8>}, {pipeline_mode = #tpu.pipeline_mode<synchronous>, transform_indices = @transform_3, window_bounds = array<i64: 8, 128>}, {transform_indices = @transform_4, window_bounds = array<i64: 2, 128>}, {transform_indices = @transform_5, window_bounds = array<i64: 1, 1>}]} {
    %c0 = arith.constant 0 : index
    %c0_0 = arith.constant 0 : index
    %0 = vector.load %arg2[%c0, %c0_0] : memref<2x32xf32, #tpu.memory_space<vmem>>, vector<2x32xf32>
    %c0_1 = arith.constant 0 : index
    %c0_2 = arith.constant 0 : index
    %1 = vector.load %arg1[%c0_1, %c0_2] : memref<2x32xf32, #tpu.memory_space<vmem>>, vector<2x32xf32>
    %2 = arith.mulf %0, %0 : vector<2x32xf32>
    %cst = arith.constant dense<0.000000e+00> : vector<2xf32>
    %3 = vector.multi_reduction <add>, %2, %cst [1] : vector<2x32xf32> to vector<2xf32>
    %4 = vector.shape_cast %3 : vector<2xf32> to vector<2x1xf32>
    %cst_3 = arith.constant 1.000000e-24 : f32
    %5 = vector.broadcast %cst_3 : f32 to vector<2x1xf32>
    %6 = arith.cmpf ogt, %4, %5 : vector<2x1xf32>
    %7 = math.rsqrt %4 : vector<2x1xf32>
    %cst_4 = arith.constant 9.99999995E+11 : f32
    %8 = vector.broadcast %cst_4 : f32 to vector<2x1xf32>
    %9 = arith.select %6, %7, %8 : vector<2x1xi1>, vector<2x1xf32>
    %10 = vector.broadcast %9 : vector<2x1xf32> to vector<2x32xf32>
    %11 = arith.mulf %0, %10 : vector<2x32xf32>
    %12 = arith.truncf %11 : vector<2x32xf32> to vector<2x32xbf16>
    %c0_5 = arith.constant 0 : index
    %c0_6 = arith.constant 0 : index
    %13 = vector.load %arg3[%c0_5, %c0_6] : memref<32x8xbf16, #tpu.memory_space<vmem>>, vector<32x8xbf16>
    %cst_7 = arith.constant dense<0.000000e+00> : vector<2x8xf32>
    %14 = tpu.matmul %12, %13, %cst_7 {dimension_numbers = #tpu.dot_dimension_numbers<[1], [0], [0], [1], [0, 0, 1, 1], [], []>} : vector<2x32xbf16>, vector<32x8xbf16>, vector<2x8xf32> -> vector<2x8xf32>
    %15 = arith.truncf %14 : vector<2x8xf32> to vector<2x8xbf16>
    %c0_8 = arith.constant 0 : index
    %c0_9 = arith.constant 0 : index
    %16 = vector.load %arg4[%c0_8, %c0_9] : memref<8x128xbf16, #tpu.memory_space<vmem>>, vector<8x128xbf16>
    %cst_10 = arith.constant dense<0.000000e+00> : vector<2x128xf32>
    %17 = tpu.matmul %15, %16, %cst_10 {dimension_numbers = #tpu.dot_dimension_numbers<[1], [0], [0], [1], [0, 0, 1, 1], [], []>} : vector<2x8xbf16>, vector<8x128xbf16>, vector<2x128xf32> -> vector<2x128xf32>
    %18 = arith.truncf %17 : vector<2x128xf32> to vector<2x128xbf16>
    %c0_11 = arith.constant 0 : index
    %c0_12 = arith.constant 0 : index
    %19 = vector.load %arg5[%c0_11, %c0_12] : memref<2x128xbf16, #tpu.memory_space<vmem>>, vector<2x128xbf16>
    tpu.vector_store %arg5[%c0_11, %c0_12], %18 {strides = array<i32>} : memref<2x128xbf16, #tpu.memory_space<vmem>>, vector<2x128xbf16>,
    %20 = arith.subf %0, %1 : vector<2x32xf32>
    %21 = arith.mulf %20, %20 : vector<2x32xf32>
    %22 = vector.shape_cast %21 : vector<2x32xf32> to vector<1x2x32xf32>
    %cst_13 = arith.constant dense<0.000000e+00> : vector<1xf32>
    %23 = vector.multi_reduction <add>, %22, %cst_13 [1, 2] : vector<1x2x32xf32> to vector<1xf32>
    %24 = vector.shape_cast %23 : vector<1xf32> to vector<1x1x1xf32>
    %25 = vector.extract %24[0, 0, 0] : f32 from vector<1x1x1xf32>
    %c0_14 = arith.constant 0 : index
    %c0_15 = arith.constant 0 : index
    %26 = memref.load %arg6[%c0_14, %c0_15] : memref<1x1xf32, #tpu.memory_space<smem>>
    memref.store %25, %arg6[%c0_14, %c0_15] : memref<1x1xf32, #tpu.memory_space<smem>>
    return
  }
  func.func @transform_0(%arg0: i32) -> (i32, i32) {
    %c0_i32 = arith.constant 0 : i32
    %c0_i32_0 = arith.constant 0 : i32
    return %arg0, %c0_i32 : i32, i32
  }
  func.func @transform_1(%arg0: i32) -> (i32, i32) {
    %c0_i32 = arith.constant 0 : i32
    %c0_i32_0 = arith.constant 0 : i32
    return %arg0, %c0_i32 : i32, i32
  }
  func.func @transform_2(%arg0: i32) -> (i32, i32) {
    %c0_i32 = arith.constant 0 : i32
    %c0_i32_0 = arith.constant 0 : i32
    %c0_i32_1 = arith.constant 0 : i32
    return %c0_i32, %c0_i32_0 : i32, i32
  }
  func.func @transform_3(%arg0: i32) -> (i32, i32) {
    %c0_i32 = arith.constant 0 : i32
    %c0_i32_0 = arith.constant 0 : i32
    %c0_i32_1 = arith.constant 0 : i32
    return %c0_i32, %c0_i32_0 : i32, i32
  }
  func.func @transform_4(%arg0: i32) -> (i32, i32) {
    %c0_i32 = arith.constant 0 : i32
    %c0_i32_0 = arith.constant 0 : i32
    return %arg0, %c0_i32 : i32, i32
  }
  func.func @transform_5(%arg0: i32) -> (i32, i32) {
    %c0_i32 = arith.constant 0 : i32
    %c0_i32_0 = arith.constant 0 : i32
    return %arg0, %c0_i32 : i32, i32
  }
}

</mosaic_0001>

<bundles_post_ra>
// kernel: tpu_custom_call.1
= control target key start
LH: loop header
LB: loop body
LE: loop exit
PB: predicated region body
PF: predicated region fallthrough
CT: control target
= control target key end

     0   :  { %11 = vsyncpa [#allocation3], 0  ;;  %vm25_vm0 = vcmask 254976   ;;  %s257_s0 = inlined_call_operand.vmem [shape: f32[2,32], index: 0, kind: input, shape index: {}]   ;;  %s258_s1 = inlined_call_operand.vmem [shape: f32[2,32], index: 1, kind: input, shape index: {}]   ;;  %s259_s2 = inlined_call_operand.vmem [shape: bf16[32,8], index: 2, kind: input, shape index: {}]   ;;  %s260_s3 = inlined_call_operand.vmem [shape: bf16[8,128], index: 3, kind: input, shape index: {}]   ;;  %s261_s4 = inlined_call_operand.hbm [shape: bf16[2,128], index: 4, kind: output, shape index: {0}]   ;;  %s262_s5 = inlined_call_operand.hbm [shape: f32[1,1], index: 5, kind: output, shape index: {1}]  }
   0x1   :  { %v22_v0 = vld [vmem:[%s258_s1] sm:$0x3] }
   0x2   :  { %12 = vsyncpa [#allocation4], 0  ;;  %v24_v1 = vmul.f32 %v22_v0, %v22_v0  ;;  %v157_v3 = vld [vmem:[%s259_s2 + $0x8] sm:$0xff]  ;;  %v156_v4 = vld [vmem:[%s259_s2] sm:$0xff]  ;;  %vm59_vm5 = vcmask 261120   ;;  %vm82_vm6 = vcmask 1043456  }
   0x3   :  { %69 = vmatpush.bf16.msra.mxu0 %v157_v3  ;;  %v23_v5 = vld [vmem:[%s257_s0] sm:$0x3]  ;;  %vm78_vm7 = vcmask 64512   ;;  %s204_s28 = smov [#allocation5]   ;;  %s205_s29 = smov [#allocation2]  }
   0x4   :  { %v26_v2 = vsel %vm25_vm0, %v24_v1, 0.0  ;;  %v101_v6 = vsub.f32 %v22_v0, %v23_v5  ;;  %v77_v20 = vld [vmem:[%s260_s3] sm:$0xf]  ;;  %s131_s3 = sshll.u32 %s262_s5, 4  ;;  %s120_s30 = sshll.u32 %s205_s29, 4  ;;  %s132_s3 = int_to_ptr.hbm [resolvable:$true] %s131_s3  ;;  %s121_s30 = int_to_ptr.vmem [resolvable:$true] %s120_s30 }
   0x5   :  { %27 = vadd.xlane.f32.xlu0 %v26_v2  ;;  %v84_v21 = vsel %vm82_vm6, %v77_v20, 0  ;;  %s122_s8 = sshll.u32 %s261_s4, 4  ;;  %s123_s8 = int_to_ptr.hbm [resolvable:$true] %s122_s8 }
   0x6   :  { %v102_v7 = vmul.f32 %v101_v6, %v101_v6  ;;  %93 = vmatpush.bf16.msra.mxu1 %v84_v21 }
   0x7   :  { %70 = vmatpush.bf16.msra.mxu0 %v156_v4 }
   0x8   :  { %v103_v8 = vsel %vm25_vm0, %v102_v7, 0.0 }
   0xd   :  { %104 = vadd.xlane.f32.xlu0 %v103_v8 }
  0x78   :  { %v28_v9 = vpop.xlane.xlu0 %27 }
  0x79   :  { %162 = vrsqrt.f32 %v28_v9  ;;  %vm36_vm2 = vweird.f32 %v28_v9  ;;  %vm29_vm4 = vcmp.gt.f32.partialorder %v28_v9, 1e-24 }
  0x7f   :  { %v163_v10 = vpop.eup %162 }
  0x80   :  { %v31_v11 = vmul.f32 %v163_v10, %v28_v9  ;;  %vm37_vm1 = vweird.f32 %v163_v10  ;;  %v105_v22 = vpop.xlane.xlu0 %104 }
  0x81   :  { %vm38_vm3 = vmor %vm36_vm2, %vm37_vm1  ;;  %v106_v23 = vrot.slane %v105_v22, 4 }
  0x82   :  { %v32_v12 = vmul.f32 %v163_v10, %v31_v11 }
  0x83   :  { %v107_v24 = vadd.f32 %v106_v23, %v105_v22 }
  0x84   :  { %v33_v13 = vmul.f32 0.5, %v32_v12 }
  0x85   :  { %v108_v25 = vrot.slane %v107_v24, 2 }
  0x86   :  { %v34_v14 = vsub.f32 1.5, %v33_v13 }
  0x87   :  { %v109_v26 = vadd.f32 %v108_v25, %v107_v24 }
  0x88   :  { %v35_v15 = vmul.f32 %v163_v10, %v34_v14 }
  0x89   :  { %v110_v27 = vrot.slane %v109_v26, 1 }
  0x8a   :  { %v39_v16 = vsel %vm38_vm3, %v163_v10, %v35_v15 }
  0x8b   :  { %v40_v17 = vsel %vm29_vm4, %v39_v16, 1e+12  ;;  %v111_v28 = vadd.f32 %v110_v27, %v109_v26 }
  0x8c   :  { %v41_v18 = vmul.f32 %v40_v17, %v22_v0 }
  0x8d   :  { %158 = vpush %v111_v28 }
  0x8e   :  { %v42_v19 = vpack.c.bf16 %v41_v18, %v41_v18 }
  0x90   :  { %154 = vmatmul.msk.bf16.vlgmr.msra.gmra.mxu0 %vm59_vm5, %v42_v19 }
  0xbe   :  { %s159_s27 = spop %158 }
  0xbf   :  { %114 = sst [smem:[#allocation5]] %s159_s27 }
  0xc0   :  { %134 = dma.smem_to_hbm %s204_s28, 16, %s132_s3, [#allocation4]  }
 0x10d   :  { %v72_v29 = vpop.f32.mrf.mxu0 }
 0x10e   :  { %v76_v30 = vpack.c.bf16 %v72_v29, %v72_v29 }
 0x110   :  { %155 = vmatmul.msk.bf16.vlgmr.msra.gmra.mxu1 %vm78_vm7, %v76_v30 }
 0x115   :  { %v74_v31 = vpop.f32.mrf.mxu0 }
 0x18d   :  { %v95_v32 = vpop.f32.mrf.mxu1 }
 0x18e   :  { %v99_v33 = vpack.c.bf16 %v95_v32, %v95_v32 }
 0x190   :  { %100 = vst [vmem:[#allocation2] sm:$0x1] %v99_v33 }
 0x191   :  { %125 = dma.vmem_to_hbm [thread:$0]  %s121_s30, 16, %s123_s8, [#allocation3]  }
 0x195   :  { %v97_v34 = vpop.f32.mrf.mxu1 }
 0x196   :  { %200 = dma.done.wait [#allocation3], 16  }
 0x197   :  { %201 = vsyncadd [#allocation3], 4294967280 }
 0x198   :  { %202 = dma.done.wait [#allocation4], 16  }
 0x199   :  { %203 = vsyncadd [#allocation4], 4294967280 }
 0x19a   :  { %143 = sfence }
 0x19b   :  { %144 = vsyncpa [#allocation3], 1 }
 0x19c   :  { %145 = vsyncpa [#allocation4], 1 }

// kernel: tpu_custom_call.1
= control target key start
LH: loop header
LB: loop body
LE: loop exit
PB: predicated region body
PF: predicated region fallthrough
CT: control target
= control target key end

     0   :  { %11 = vsyncpa [#allocation3], 0  ;;  %vm25_vm0 = vcmask 254976   ;;  %s257_s0 = inlined_call_operand.vmem [shape: f32[2,32], index: 0, kind: input, shape index: {}]   ;;  %s258_s1 = inlined_call_operand.vmem [shape: f32[2,32], index: 1, kind: input, shape index: {}]   ;;  %s259_s2 = inlined_call_operand.vmem [shape: bf16[32,8], index: 2, kind: input, shape index: {}]   ;;  %s260_s3 = inlined_call_operand.vmem [shape: bf16[8,128], index: 3, kind: input, shape index: {}]   ;;  %s261_s4 = inlined_call_operand.hbm [shape: bf16[2,128], index: 4, kind: output, shape index: {0}]   ;;  %s262_s5 = inlined_call_operand.hbm [shape: f32[1,1], index: 5, kind: output, shape index: {1}]  }
   0x1   :  { %v22_v0 = vld [vmem:[%s258_s1] sm:$0x3] }
   0x2   :  { %12 = vsyncpa [#allocation4], 0  ;;  %v24_v1 = vmul.f32 %v22_v0, %v22_v0  ;;  %v157_v3 = vld [vmem:[%s259_s2 + $0x8] sm:$0xff]  ;;  %v156_v4 = vld [vmem:[%s259_s2] sm:$0xff]  ;;  %vm59_vm5 = vcmask 261120   ;;  %vm82_vm6 = vcmask 1043456  }
   0x3   :  { %69 = vmatpush.bf16.msra.mxu0 %v157_v3  ;;  %v23_v5 = vld [vmem:[%s257_s0] sm:$0x3]  ;;  %vm78_vm7 = vcmask 64512   ;;  %s204_s28 = smov [#allocation5]   ;;  %s205_s29 = smov [#allocation2]  }
   0x4   :  { %v26_v2 = vsel %vm25_vm0, %v24_v1, 0.0  ;;  %v101_v6 = vsub.f32 %v22_v0, %v23_v5  ;;  %v77_v20 = vld [vmem:[%s260_s3] sm:$0xf]  ;;  %s131_s3 = sshll.u32 %s262_s5, 4  ;;  %s120_s30 = sshll.u32 %s205_s29, 4  ;;  %s132_s3 = int_to_ptr.hbm [resolvable:$true] %s131_s3  ;;  %s121_s30 = int_to_ptr.vmem [resolvable:$true] %s120_s30 }
   0x5   :  { %27 = vadd.xlane.f32.xlu0 %v26_v2  ;;  %v84_v21 = vsel %vm82_vm6, %v77_v20, 0  ;;  %s122_s8 = sshll.u32 %s261_s4, 4  ;;  %s123_s8 = int_to_ptr.hbm [resolvable:$true] %s122_s8 }
   0x6   :  { %v102_v7 = vmul.f32 %v101_v6, %v101_v6  ;;  %93 = vmatpush.bf16.msra.mxu1 %v84_v21 }
   0x7   :  { %70 = vmatpush.bf16.msra.mxu0 %v156_v4 }
   0x8   :  { %v103_v8 = vsel %vm25_vm0, %v102_v7, 0.0 }
   0xd   :  { %104 = vadd.xlane.f32.xlu0 %v103_v8 }
  0x78   :  { %v28_v9 = vpop.xlane.xlu0 %27 }
  0x79   :  { %162 = vrsqrt.f32 %v28_v9  ;;  %vm36_vm2 = vweird.f32 %v28_v9  ;;  %vm29_vm4 = vcmp.gt.f32.partialorder %v28_v9, 1e-24 }
  0x7f   :  { %v163_v10 = vpop.eup %162 }
  0x80   :  { %v31_v11 = vmul.f32 %v163_v10, %v28_v9  ;;  %vm37_vm1 = vweird.f32 %v163_v10  ;;  %v105_v22 = vpop.xlane.xlu0 %104 }
  0x81   :  { %vm38_vm3 = vmor %vm36_vm2, %vm37_vm1  ;;  %v106_v23 = vrot.slane %v105_v22, 4 }
  0x82   :  { %v32_v12 = vmul.f32 %v163_v10, %v31_v11 }
  0x83   :  { %v107_v24 = vadd.f32 %v106_v23, %v105_v22 }
  0x84   :  { %v33_v13 = vmul.f32 0.5, %v32_v12 }
  0x85   :  { %v108_v25 = vrot.slane %v107_v24, 2 }
  0x86   :  { %v34_v14 = vsub.f32 1.5, %v33_v13 }
  0x87   :  { %v109_v26 = vadd.f32 %v108_v25, %v107_v24 }
  0x88   :  { %v35_v15 = vmul.f32 %v163_v10, %v34_v14 }
  0x89   :  { %v110_v27 = vrot.slane %v109_v26, 1 }
  0x8a   :  { %v39_v16 = vsel %vm38_vm3, %v163_v10, %v35_v15 }
  0x8b   :  { %v40_v17 = vsel %vm29_vm4, %v39_v16, 1e+12  ;;  %v111_v28 = vadd.f32 %v110_v27, %v109_v26 }
  0x8c   :  { %v41_v18 = vmul.f32 %v40_v17, %v22_v0 }
  0x8d   :  { %158 = vpush %v111_v28 }
  0x8e   :  { %v42_v19 = vpack.c.bf16 %v41_v18, %v41_v18 }
  0x90   :  { %154 = vmatmul.msk.bf16.vlgmr.msra.gmra.mxu0 %vm59_vm5, %v42_v19 }
  0xbe   :  { %s159_s27 = spop %158 }
  0xbf   :  { %114 = sst [smem:[#allocation5]] %s159_s27 }
  0xc0   :  { %134 = dma.smem_to_hbm %s204_s28, 16, %s132_s3, [#allocation4]  }
 0x10d   :  { %v72_v29 = vpop.f32.mrf.mxu0 }
 0x10e   :  { %v76_v30 = vpack.c.bf16 %v72_v29, %v72_v29 }
 0x110   :  { %155 = vmatmul.msk.bf16.vlgmr.msra.gmra.mxu1 %vm78_vm7, %v76_v30 }
 0x115   :  { %v74_v31 = vpop.f32.mrf.mxu0 }
 0x18d   :  { %v95_v32 = vpop.f32.mrf.mxu1 }
 0x18e   :  { %v99_v33 = vpack.c.bf16 %v95_v32, %v95_v32 }
 0x190   :  { %100 = vst [vmem:[#allocation2] sm:$0x1] %v99_v33 }
 0x191   :  { %125 = dma.vmem_to_hbm [thread:$0]  %s121_s30, 16, %s123_s8, [#allocation3]  }
 0x195   :  { %v97_v34 = vpop.f32.mrf.mxu1 }
 0x196   :  { %200 = dma.done.wait [#allocation3], 16  }
 0x197   :  { %201 = vsyncadd [#allocation3], 4294967280 }
 0x198   :  { %202 = dma.done.wait [#allocation4], 16  }
 0x199   :  { %203 = vsyncadd [#allocation4], 4294967280 }
 0x19a   :  { %143 = sfence }
 0x19b   :  { %144 = vsyncpa [#allocation3], 1 }
 0x19c   :  { %145 = vsyncpa [#allocation4], 1 }

</bundles_post_ra>
